<compile_context>
chip_gen: v6e
topology: v6e:2x2x1
jax: 0.10.0
libtpu: 0.0.40
codegen_flags: <defaults>
</compile_context>

<pallas_src>
import functools

import jax
import jax.numpy as jnp
from jax.experimental import pallas as pl
from jax.experimental.pallas import tpu as pltpu


def _mha_fusion_kernel(tgt_ref, vis_ref, act_ref,
                       wq_ref, wk_ref, wv_ref,
                       bq_ref, bk_ref, bv_ref,
                       rs_ref, c_ref, wf_ref, bf_ref,
                       out_ref, *, hhd):
    f32 = jnp.float32
    bf16 = jnp.bfloat16

    # (1) q/k/v projections, pre-expanded onto lanes indexed (h, j, d).
    #     bf16 operands, f32 accumulate; the 1/sqrt(Dh) scale is folded into wq/bq.
    q_exp = jnp.dot(tgt_ref[...], wq_ref[...], preferred_element_type=f32) + bq_ref[...]
    k_exp = jnp.dot(vis_ref[...], wk_ref[...], preferred_element_type=f32) + bk_ref[...]
    v_exp = jnp.dot(act_ref[...], wv_ref[...], preferred_element_type=f32) + bv_ref[...]

    # (2) scores[b, h*H+j] = sum_d q[b,h,d] * k[b,j,d]   (VPU product + MXU reduction via RS)
    s = jnp.dot((q_exp * k_exp).astype(bf16), rs_ref[...], preferred_element_type=f32)

    # (3) softmax over keys j within each head h (groups of H contiguous score lanes).
    #     Subtracting the GLOBAL row max is a constant per-head shift -> identical softmax.
    #     (A head sitting >~80 below the row max would underflow; fine at these magnitudes,
    #      guarded by the denominator floor below.)
    m = jnp.max(s, axis=-1, keepdims=True)
    e = jnp.exp(s - m)

    #     One 256-lane constant matmul yields the lane-expanded numerator (first HHD lanes)
    #     AND the per-head denominator broadcast (last HHD lanes) — DN is folded into EW.
    t = jnp.dot(e.astype(bf16), c_ref[...], preferred_element_type=f32)
    num_exp = t[:, :hhd]
    den_exp = t[:, hhd:]
    inv_den = pl.reciprocal(jnp.maximum(den_exp, 1e-30), approx=True)   # EUP vrcp (free slot)

    # (4) context (sum over j folded into wf_ref) + output projection + ReLU, lane-dense store.
    ctx_lanes = num_exp * v_exp * inv_den
    out = jnp.dot(ctx_lanes.astype(bf16), wf_ref[...], preferred_element_type=f32) + bf_ref[...]
    out_ref[...] = jnp.maximum(out, 0.0)


def build_fused_operands(params, *, num_heads):
    """One-time host-side weight folding.  Call once at model init and reuse every step."""
    f32 = jnp.float32
    bf16 = jnp.bfloat16
    dim_out = params["wq"].shape[1]
    H = num_heads
    assert dim_out % H == 0, "dim_out must be divisible by num_heads"
    Dh = dim_out // H
    HH = H * H
    HHD = H * H * Dh      # expanded lane count (=128 here); keep a multiple of 128 so the
                          # in-kernel lane slices stay aligned (perf, not correctness).
    scale = 1.0 / (Dh ** 0.5)

    hh, jj, dd = jnp.meshgrid(jnp.arange(H), jnp.arange(H), jnp.arange(Dh), indexing="ij")
    lane = (hh * (H * Dh) + jj * Dh + dd).reshape(-1)   # expanded lane index for (h, j, d)
    q_src = (hh * Dh + dd).reshape(-1)                  # q / context feature index
    kv_src = (jj * Dh + dd).reshape(-1)                 # k / v feature index
    hj = (hh * H + jj).reshape(-1)                      # flattened (head, key) score index

    EQ = jnp.zeros((dim_out, HHD), f32).at[q_src, lane].set(1.0)
    EK = jnp.zeros((dim_out, HHD), f32).at[kv_src, lane].set(1.0)
    RS = jnp.zeros((HHD, HH), f32).at[lane, hj].set(1.0)
    EW = jnp.zeros((HH, HHD), f32).at[hj, lane].set(1.0)
    DN = jnp.kron(jnp.eye(H, dtype=f32), jnp.ones((H, H), f32))   # per-head sum, broadcast
    CT = jnp.zeros((HHD, dim_out), f32).at[lane, q_src].set(1.0)  # sum over j

    # DN folded into EW: one 2*HHD-lane constant = [numerator expansion | denominator bcast]
    C = jnp.concatenate([EW, DN @ EW], axis=1)

    # Output projection with the context reduction folded in; lanes padded to a 128-multiple
    # so the final store is lane-dense.
    n_pad = -(-dim_out // 128) * 128
    Wf_big = jnp.pad(CT @ params["wf"], ((0, 0), (0, n_pad - dim_out)))
    bf_big = jnp.pad(params["bf"], ((0, 0), (0, n_pad - dim_out)))

    return {
        # bf16 matmul operands (the 0/1 expansion matrices are exact in bf16)
        "wq": ((params["wq"] * scale) @ EQ).astype(bf16),
        "wk": (params["wk"] @ EK).astype(bf16),
        "wv": (params["wv"] @ EK).astype(bf16),
        "rs": RS.astype(bf16),
        "c": C.astype(bf16),
        "wf": Wf_big.astype(bf16),
        # f32 post-matmul biases
        "bq": (params["bq"] * scale) @ EQ,
        "bk": params["bk"] @ EK,
        "bv": params["bv"] @ EK,
        "bf": bf_big,
        # metadata
        "hhd": HHD, "hh": HH, "dim_out": dim_out, "n_pad": n_pad,
    }


def mha_fusion(visual, target, action, fused, *, block_b=None):
    if visual.ndim > 2:
        visual = visual.reshape(visual.shape[0], -1)   # torch .view(B, -1)
    B = visual.shape[0]
    HHD, HH = fused["hhd"], fused["hh"]
    n_pad, dim_out = fused["n_pad"], fused["dim_out"]
    dim_t, dim_v, dim_a = target.shape[1], visual.shape[1], action.shape[1]

    bf16 = jnp.bfloat16
    target = target.astype(bf16)
    visual = visual.astype(bf16)
    action = action.astype(bf16)

    # Batch tile: big tiles amortize the ~0.35us/step overhead (the body is a short,
    # latency-dominated matmul chain).  Cap at 512 so per-step VMEM stays tiny everywhere
    # (incl. v7x's 64 MiB) and B_pad/TB >= 2 for large batches, letting the 'parallel'
    # grid axis shard across v7x's two TensorCores.
    TB = block_b if block_b is not None else min(512, -(-B // 8) * 8)
    B_pad = -(-B // TB) * TB
    if B_pad != B:
        pad = ((0, B_pad - B), (0, 0))
        target = jnp.pad(target, pad)
        visual = jnp.pad(visual, pad)
        action = jnp.pad(action, pad)

    kernel = functools.partial(_mha_fusion_kernel, hhd=HHD)
    const = lambda i: (0, 0)   # grid-invariant operands stay VMEM-resident across steps
    rows = lambda i: (i, 0)

    out = pl.pallas_call(
        kernel,
        out_shape=jax.ShapeDtypeStruct((B_pad, n_pad), jnp.float32),
        grid=(B_pad // TB,),
        in_specs=[
            pl.BlockSpec((TB, dim_t), rows),        # target rows   (bf16)
            pl.BlockSpec((TB, dim_v), rows),        # visual rows   (bf16)
            pl.BlockSpec((TB, dim_a), rows),        # action rows   (bf16)
            pl.BlockSpec((dim_t, HHD), const),      # scale*Wq @ EQ (bf16)
            pl.BlockSpec((dim_v, HHD), const),      # Wk @ EK       (bf16)
            pl.BlockSpec((dim_a, HHD), const),      # Wv @ EK       (bf16)
            pl.BlockSpec((1, HHD), const),          # scale*bq @ EQ (f32)
            pl.BlockSpec((1, HHD), const),          # bk @ EK       (f32)
            pl.BlockSpec((1, HHD), const),          # bv @ EK       (f32)
            pl.BlockSpec((HHD, HH), const),         # RS: reduce over d
            pl.BlockSpec((HH, 2 * HHD), const),     # [EW | DN@EW]: numerator + denominator
            pl.BlockSpec((HHD, n_pad), const),      # CT @ Wf (lane-padded)
            pl.BlockSpec((1, n_pad), const),        # bf (lane-padded)
        ],
        out_specs=pl.BlockSpec((TB, n_pad), rows),
        compiler_params=pltpu.CompilerParams(
            dimension_semantics=("parallel",),      # shards batch across TCs on v7x
            vmem_limit_bytes=32 * 1024 * 1024,      # explicit & safe on v5e/v6e/v7x
        ),
    )(target, visual, action,
      fused["wq"], fused["wk"], fused["wv"],
      fused["bq"], fused["bk"], fused["bv"],
      fused["rs"], fused["c"], fused["wf"], fused["bf"])

    return out[:B, :dim_out]


def mha_fusion_ref(visual, target, action, params, *, num_heads):
    """Pure-JAX reference mirroring the PyTorch forward exactly."""
    if visual.ndim > 2:
        visual = visual.reshape(visual.shape[0], -1)
    B = visual.shape[0]
    dim_out = params["wq"].shape[1]
    dph = dim_out // num_heads

    q = (target @ params["wq"] + params["bq"]).reshape(B, num_heads, dph)
    k = (visual @ params["wk"] + params["bk"]).reshape(B, num_heads, dph)
    v = (action @ params["wv"] + params["bv"]).reshape(B, num_heads, dph)

    scores = jnp.einsum("bhd,bjd->bhj", q, k) / (dph ** 0.5)
    attn = jax.nn.softmax(scores, axis=-1)
    context = jnp.einsum("bhj,bjd->bhd", attn, v).reshape(B, -1)
    return jax.nn.relu(context @ params["wf"] + params["bf"])


def init_params(key, dim_visual, dim_target, dim_action, dim_out):
    ks = jax.random.split(key, 8)
    s = 0.1
    return {
        "wq": s * jax.random.normal(ks[0], (dim_target, dim_out), jnp.float32),
        "bq": s * jax.random.normal(ks[1], (1, dim_out), jnp.float32),
        "wk": s * jax.random.normal(ks[2], (dim_visual, dim_out), jnp.float32),
        "bk": s * jax.random.normal(ks[3], (1, dim_out), jnp.float32),
        "wv": s * jax.random.normal(ks[4], (dim_action, dim_out), jnp.float32),
        "bv": s * jax.random.normal(ks[5], (1, dim_out), jnp.float32),
        "wf": s * jax.random.normal(ks[6], (dim_out, dim_out), jnp.float32),
        "bf": s * jax.random.normal(ks[7], (1, dim_out), jnp.float32),
    }


if __name__ == "__main__":
    key = jax.random.PRNGKey(0)
    k_vis, k_tgt, k_act, k_par = jax.random.split(key, 4)

    B = 2
    C, Hs, Ws = 4, 4, 4            # visual is NCHW, flattened inside the wrapper
    dim_visual = C * Hs * Ws       # 64
    dim_target = 16
    dim_action = 8
    dim_out = 32
    num_heads = 4

    visual = jax.random.normal(k_vis, (B, C, Hs, Ws), jnp.float32)
    target = jax.random.normal(k_tgt, (B, dim_target), jnp.float32)
    action = jax.random.normal(k_act, (B, dim_action), jnp.float32)
    params = init_params(k_par, dim_visual, dim_target, dim_action, dim_out)

    # One-time constant folding (kept off the per-call path).
    fused = build_fused_operands(params, num_heads=num_heads)

    out = mha_fusion(visual, target, action, fused)
    out = jax.block_until_ready(out)

    ref = mha_fusion_ref(visual, target, action, params, num_heads=num_heads)
    assert out.shape == (B, dim_out)
    # bf16 matmul operands (f32 accumulate) + approx EUP reciprocal -> relaxed tolerance.
    assert jnp.allclose(out, ref, atol=2e-2, rtol=2e-2), (
        f"mismatch vs JAX reference: max abs diff "
        f"{float(jnp.max(jnp.abs(out - ref))):.3e}")

    print("KERNEL_OK")
</pallas_src>

<mosaic_0001>
module attributes {stable_mosaic.version = 11 : i64} {
  func.func @_mha_fusion_kernel(%arg0: i32, %arg1: memref<8x16xbf16, #tpu.memory_space<vmem>>, %arg2: memref<8x64xbf16, #tpu.memory_space<vmem>>, %arg3: memref<8x8xbf16, #tpu.memory_space<vmem>>, %arg4: memref<16x128xbf16, #tpu.memory_space<vmem>>, %arg5: memref<64x128xbf16, #tpu.memory_space<vmem>>, %arg6: memref<8x128xbf16, #tpu.memory_space<vmem>>, %arg7: memref<1x128xf32, #tpu.memory_space<vmem>>, %arg8: memref<1x128xf32, #tpu.memory_space<vmem>>, %arg9: memref<1x128xf32, #tpu.memory_space<vmem>>, %arg10: memref<128x16xbf16, #tpu.memory_space<vmem>>, %arg11: memref<16x256xbf16, #tpu.memory_space<vmem>>, %arg12: memref<128x128xbf16, #tpu.memory_space<vmem>>, %arg13: memref<1x128xf32, #tpu.memory_space<vmem>>, %arg14: memref<8x128xf32, #tpu.memory_space<vmem>>) attributes {dimension_semantics = [#tpu.dimension_semantics<parallel>], iteration_bounds = array<i64: 1>, scalar_prefetch = 0 : i64, scratch_operands = 0 : i64, tpu.core_type = #tpu.core_type<tc>, window_params = [{transform_indices = @transform_0, window_bounds = array<i64: 8, 16>}, {transform_indices = @transform_1, window_bounds = array<i64: 8, 64>}, {transform_indices = @transform_2, window_bounds = array<i64: 8, 8>}, {pipeline_mode = #tpu.pipeline_mode<synchronous>, transform_indices = @transform_3, window_bounds = array<i64: 16, 128>}, {pipeline_mode = #tpu.pipeline_mode<synchronous>, transform_indices = @transform_4, window_bounds = array<i64: 64, 128>}, {pipeline_mode = #tpu.pipeline_mode<synchronous>, transform_indices = @transform_5, window_bounds = array<i64: 8, 128>}, {pipeline_mode = #tpu.pipeline_mode<synchronous>, transform_indices = @transform_6, window_bounds = array<i64: 1, 128>}, {pipeline_mode = #tpu.pipeline_mode<synchronous>, transform_indices = @transform_7, window_bounds = array<i64: 1, 128>}, {pipeline_mode = #tpu.pipeline_mode<synchronous>, transform_indices = @transform_8, window_bounds = array<i64: 1, 128>}, {pipeline_mode = #tpu.pipeline_mode<synchronous>, transform_indices = @transform_9, window_bounds = array<i64: 128, 16>}, {pipeline_mode = #tpu.pipeline_mode<synchronous>, transform_indices = @transform_10, window_bounds = array<i64: 16, 256>}, {pipeline_mode = #tpu.pipeline_mode<synchronous>, transform_indices = @transform_11, window_bounds = array<i64: 128, 128>}, {pipeline_mode = #tpu.pipeline_mode<synchronous>, transform_indices = @transform_12, window_bounds = array<i64: 1, 128>}, {transform_indices = @transform_13, window_bounds = array<i64: 8, 128>}]} {
    %c0 = arith.constant 0 : index
    %c0_0 = arith.constant 0 : index
    %0 = vector.load %arg1[%c0, %c0_0] : memref<8x16xbf16, #tpu.memory_space<vmem>>, vector<8x16xbf16>
    %c0_1 = arith.constant 0 : index
    %c0_2 = arith.constant 0 : index
    %1 = vector.load %arg4[%c0_1, %c0_2] : memref<16x128xbf16, #tpu.memory_space<vmem>>, vector<16x128xbf16>
    %cst = arith.constant dense<0.000000e+00> : vector<8x128xf32>
    %2 = tpu.matmul %0, %1, %cst {dimension_numbers = #tpu.dot_dimension_numbers<[1], [0], [0], [1], [0, 0, 1, 1], [], []>} : vector<8x16xbf16>, vector<16x128xbf16>, vector<8x128xf32> -> vector<8x128xf32>
    %c0_3 = arith.constant 0 : index
    %c0_4 = arith.constant 0 : index
    %3 = vector.load %arg7[%c0_3, %c0_4] : memref<1x128xf32, #tpu.memory_space<vmem>>, vector<1x128xf32>
    %4 = vector.broadcast %3 : vector<1x128xf32> to vector<8x128xf32>
    %5 = arith.addf %2, %4 : vector<8x128xf32>
    %c0_5 = arith.constant 0 : index
    %c0_6 = arith.constant 0 : index
    %6 = vector.load %arg2[%c0_5, %c0_6] : memref<8x64xbf16, #tpu.memory_space<vmem>>, vector<8x64xbf16>
    %c0_7 = arith.constant 0 : index
    %c0_8 = arith.constant 0 : index
    %7 = vector.load %arg5[%c0_7, %c0_8] : memref<64x128xbf16, #tpu.memory_space<vmem>>, vector<64x128xbf16>
    %cst_9 = arith.constant dense<0.000000e+00> : vector<8x128xf32>
    %8 = tpu.matmul %6, %7, %cst_9 {dimension_numbers = #tpu.dot_dimension_numbers<[1], [0], [0], [1], [0, 0, 1, 1], [], []>} : vector<8x64xbf16>, vector<64x128xbf16>, vector<8x128xf32> -> vector<8x128xf32>
    %c0_10 = arith.constant 0 : index
    %c0_11 = arith.constant 0 : index
    %9 = vector.load %arg8[%c0_10, %c0_11] : memref<1x128xf32, #tpu.memory_space<vmem>>, vector<1x128xf32>
    %10 = vector.broadcast %9 : vector<1x128xf32> to vector<8x128xf32>
    %11 = arith.addf %8, %10 : vector<8x128xf32>
    %c0_12 = arith.constant 0 : index
    %c0_13 = arith.constant 0 : index
    %12 = vector.load %arg3[%c0_12, %c0_13] : memref<8x8xbf16, #tpu.memory_space<vmem>>, vector<8x8xbf16>
    %c0_14 = arith.constant 0 : index
    %c0_15 = arith.constant 0 : index
    %13 = vector.load %arg6[%c0_14, %c0_15] : memref<8x128xbf16, #tpu.memory_space<vmem>>, vector<8x128xbf16>
    %cst_16 = arith.constant dense<0.000000e+00> : vector<8x128xf32>
    %14 = tpu.matmul %12, %13, %cst_16 {dimension_numbers = #tpu.dot_dimension_numbers<[1], [0], [0], [1], [0, 0, 1, 1], [], []>} : vector<8x8xbf16>, vector<8x128xbf16>, vector<8x128xf32> -> vector<8x128xf32>
    %c0_17 = arith.constant 0 : index
    %c0_18 = arith.constant 0 : index
    %15 = vector.load %arg9[%c0_17, %c0_18] : memref<1x128xf32, #tpu.memory_space<vmem>>, vector<1x128xf32>
    %16 = vector.broadcast %15 : vector<1x128xf32> to vector<8x128xf32>
    %17 = arith.addf %14, %16 : vector<8x128xf32>
    %18 = arith.mulf %5, %11 : vector<8x128xf32>
    %19 = arith.truncf %18 : vector<8x128xf32> to vector<8x128xbf16>
    %c0_19 = arith.constant 0 : index
    %c0_20 = arith.constant 0 : index
    %20 = vector.load %arg10[%c0_19, %c0_20] : memref<128x16xbf16, #tpu.memory_space<vmem>>, vector<128x16xbf16>
    %cst_21 = arith.constant dense<0.000000e+00> : vector<8x16xf32>
    %21 = tpu.matmul %19, %20, %cst_21 {dimension_numbers = #tpu.dot_dimension_numbers<[1], [0], [0], [1], [0, 0, 1, 1], [], []>} : vector<8x128xbf16>, vector<128x16xbf16>, vector<8x16xf32> -> vector<8x16xf32>
    %cst_22 = arith.constant dense<0xFF800000> : vector<8xf32>
    %22 = vector.multi_reduction <maximumf>, %21, %cst_22 [1] : vector<8x16xf32> to vector<8xf32>
    %23 = vector.shape_cast %22 : vector<8xf32> to vector<8x1xf32>
    %24 = vector.broadcast %23 : vector<8x1xf32> to vector<8x16xf32>
    %25 = arith.subf %21, %24 : vector<8x16xf32>
    %26 = math.exp %25 : vector<8x16xf32>
    %27 = arith.truncf %26 : vector<8x16xf32> to vector<8x16xbf16>
    %c0_23 = arith.constant 0 : index
    %c0_24 = arith.constant 0 : index
    %28 = vector.load %arg11[%c0_23, %c0_24] : memref<16x256xbf16, #tpu.memory_space<vmem>>, vector<16x256xbf16>
    %cst_25 = arith.constant dense<0.000000e+00> : vector<8x256xf32>
    %29 = tpu.matmul %27, %28, %cst_25 {dimension_numbers = #tpu.dot_dimension_numbers<[1], [0], [0], [1], [0, 0, 1, 1], [], []>} : vector<8x16xbf16>, vector<16x256xbf16>, vector<8x256xf32> -> vector<8x256xf32>
    %30 = vector.extract_strided_slice %29 {offsets = [0, 0], sizes = [8, 128], strides = [1, 1]} : vector<8x256xf32> to vector<8x128xf32>
    %31 = vector.extract_strided_slice %29 {offsets = [0, 128], sizes = [8, 128], strides = [1, 1]} : vector<8x256xf32> to vector<8x128xf32>
    %cst_26 = arith.constant 1.000000e-30 : f32
    %32 = vector.broadcast %cst_26 : f32 to vector<8x128xf32>
    %33 = arith.maximumf %31, %32 : vector<8x128xf32>
    %34 = tpu.reciprocal %33 {approx = true} : vector<8x128xf32> -> vector<8x128xf32>
    %35 = arith.mulf %30, %17 : vector<8x128xf32>
    %36 = arith.mulf %35, %34 : vector<8x128xf32>
    %37 = arith.truncf %36 : vector<8x128xf32> to vector<8x128xbf16>
    %c0_27 = arith.constant 0 : index
    %c0_28 = arith.constant 0 : index
    %38 = vector.load %arg12[%c0_27, %c0_28] : memref<128x128xbf16, #tpu.memory_space<vmem>>, vector<128x128xbf16>
    %cst_29 = arith.constant dense<0.000000e+00> : vector<8x128xf32>
    %39 = tpu.matmul %37, %38, %cst_29 {dimension_numbers = #tpu.dot_dimension_numbers<[1], [0], [0], [1], [0, 0, 1, 1], [], []>} : vector<8x128xbf16>, vector<128x128xbf16>, vector<8x128xf32> -> vector<8x128xf32>
    %c0_30 = arith.constant 0 : index
    %c0_31 = arith.constant 0 : index
    %40 = vector.load %arg13[%c0_30, %c0_31] : memref<1x128xf32, #tpu.memory_space<vmem>>, vector<1x128xf32>
    %41 = vector.broadcast %40 : vector<1x128xf32> to vector<8x128xf32>
    %42 = arith.addf %39, %41 : vector<8x128xf32>
    %cst_32 = arith.constant 0.000000e+00 : f32
    %43 = vector.broadcast %cst_32 : f32 to vector<8x128xf32>
    %44 = arith.maximumf %42, %43 : vector<8x128xf32>
    %c0_33 = arith.constant 0 : index
    %c0_34 = arith.constant 0 : index
    %45 = vector.load %arg14[%c0_33, %c0_34] : memref<8x128xf32, #tpu.memory_space<vmem>>, vector<8x128xf32>
    tpu.vector_store %arg14[%c0_33, %c0_34], %44 {strides = array<i32>} : memref<8x128xf32, #tpu.memory_space<vmem>>, vector<8x128xf32>,
    return
  }
  func.func @transform_0(%arg0: i32) -> (i32, i32) {
    %c0_i32 = arith.constant 0 : i32
    %c0_i32_0 = arith.constant 0 : i32
    return %arg0, %c0_i32 : i32, i32
  }
  func.func @transform_1(%arg0: i32) -> (i32, i32) {
    %c0_i32 = arith.constant 0 : i32
    %c0_i32_0 = arith.constant 0 : i32
    return %arg0, %c0_i32 : i32, i32
  }
  func.func @transform_2(%arg0: i32) -> (i32, i32) {
    %c0_i32 = arith.constant 0 : i32
    %c0_i32_0 = arith.constant 0 : i32
    return %arg0, %c0_i32 : i32, i32
  }
  func.func @transform_3(%arg0: i32) -> (i32, i32) {
    %c0_i32 = arith.constant 0 : i32
    %c0_i32_0 = arith.constant 0 : i32
    %c0_i32_1 = arith.constant 0 : i32
    return %c0_i32, %c0_i32_0 : i32, i32
  }
  func.func @transform_4(%arg0: i32) -> (i32, i32) {
    %c0_i32 = arith.constant 0 : i32
    %c0_i32_0 = arith.constant 0 : i32
    %c0_i32_1 = arith.constant 0 : i32
    return %c0_i32, %c0_i32_0 : i32, i32
  }
  func.func @transform_5(%arg0: i32) -> (i32, i32) {
    %c0_i32 = arith.constant 0 : i32
    %c0_i32_0 = arith.constant 0 : i32
    %c0_i32_1 = arith.constant 0 : i32
    return %c0_i32, %c0_i32_0 : i32, i32
  }
  func.func @transform_6(%arg0: i32) -> (i32, i32) {
    %c0_i32 = arith.constant 0 : i32
    %c0_i32_0 = arith.constant 0 : i32
    %c0_i32_1 = arith.constant 0 : i32
    return %c0_i32, %c0_i32_0 : i32, i32
  }
  func.func @transform_7(%arg0: i32) -> (i32, i32) {
    %c0_i32 = arith.constant 0 : i32
    %c0_i32_0 = arith.constant 0 : i32
    %c0_i32_1 = arith.constant 0 : i32
    return %c0_i32, %c0_i32_0 : i32, i32
  }
  func.func @transform_8(%arg0: i32) -> (i32, i32) {
    %c0_i32 = arith.constant 0 : i32
    %c0_i32_0 = arith.constant 0 : i32
    %c0_i32_1 = arith.constant 0 : i32
    return %c0_i32, %c0_i32_0 : i32, i32
  }
  func.func @transform_9(%arg0: i32) -> (i32, i32) {
    %c0_i32 = arith.constant 0 : i32
    %c0_i32_0 = arith.constant 0 : i32
    %c0_i32_1 = arith.constant 0 : i32
    return %c0_i32, %c0_i32_0 : i32, i32
  }
  func.func @transform_10(%arg0: i32) -> (i32, i32) {
    %c0_i32 = arith.constant 0 : i32
    %c0_i32_0 = arith.constant 0 : i32
    %c0_i32_1 = arith.constant 0 : i32
    return %c0_i32, %c0_i32_0 : i32, i32
  }
  func.func @transform_11(%arg0: i32) -> (i32, i32) {
    %c0_i32 = arith.constant 0 : i32
    %c0_i32_0 = arith.constant 0 : i32
    %c0_i32_1 = arith.constant 0 : i32
    return %c0_i32, %c0_i32_0 : i32, i32
  }
  func.func @transform_12(%arg0: i32) -> (i32, i32) {
    %c0_i32 = arith.constant 0 : i32
    %c0_i32_0 = arith.constant 0 : i32
    %c0_i32_1 = arith.constant 0 : i32
    return %c0_i32, %c0_i32_0 : i32, i32
  }
  func.func @transform_13(%arg0: i32) -> (i32, i32) {
    %c0_i32 = arith.constant 0 : i32
    %c0_i32_0 = arith.constant 0 : i32
    return %arg0, %c0_i32 : i32, i32
  }
}

</mosaic_0001>

<bundles_post_ra>
// kernel: tpu_custom_call.1
= control target key start
LH: loop header
LB: loop body
LE: loop exit
PB: predicated region body
PF: predicated region fallthrough
CT: control target
= control target key end

     0   :  { %18 = vsyncpa [#allocation3], 0  ;;  %s1173_s0 = inlined_call_operand.vmem [shape: bf16[8,16], index: 0, kind: input, shape index: {}]   ;;  %s1174_s1 = inlined_call_operand.hbm [shape: bf16[8,64], index: 1, kind: input, shape index: {}]   ;;  %s1175_s2 = inlined_call_operand.hbm [shape: bf16[8,8], index: 2, kind: input, shape index: {}]   ;;  %s1176_s3 = inlined_call_operand.vmem [shape: bf16[16,128], index: 3, kind: input, shape index: {}]   ;;  %s1177_s4 = inlined_call_operand.hbm [shape: bf16[64,128], index: 4, kind: input, shape index: {}]   ;;  %s1178_s5 = inlined_call_operand.hbm [shape: bf16[8,128], index: 5, kind: input, shape index: {}]   ;;  %s1179_s6 = inlined_call_operand.hbm [shape: f32[1,128], index: 6, kind: input, shape index: {}]   ;;  %s1180_s7 = inlined_call_operand.hbm [shape: f32[1,128], index: 7, kind: input, shape index: {}]   ;;  %s1181_s8 = inlined_call_operand.hbm [shape: f32[1,128], index: 8, kind: input, shape index: {}]   ;;  %s1182_s9 = inlined_call_operand.vmem [shape: bf16[128,16], index: 9, kind: input, shape index: {}]   ;;  %s1183_s10 = inlined_call_operand.vmem [shape: bf16[16,256], index: 10, kind: input, shape index: {}]   ;;  %s1184_s11 = inlined_call_operand.vmem [shape: bf16[128,128], index: 11, kind: input, shape index: {}]   ;;  %s1185_s12 = inlined_call_operand.vmem [shape: f32[1,128], index: 12, kind: input, shape index: {}]   ;;  %s1186_s13 = inlined_call_operand.hbm [shape: f32[8,128], index: 13, kind: output, shape index: {}]  }
   0x1   :  { %19 = vsyncpa [#allocation6], 0 }
   0x2   :  { %20 = vsyncpa [#allocation9], 0 }
   0x3   :  { %21 = vsyncpa [#allocation12], 0 }
   0x4   :  { %22 = vsyncpa [#allocation4], 0  ;;  %s968_s25 = smov [#allocation5]   ;;  %s969_s27 = smov [#allocation8]  }
   0x5   :  { %s41_s26 = sshll.u32 %s968_s25, 4  ;;  %s65_s28 = sshll.u32 %s969_s27, 4  ;;  %s42_s26 = int_to_ptr.vmem [resolvable:$true] %s41_s26  ;;  %s66_s28 = int_to_ptr.vmem [resolvable:$true] %s65_s28 }
   0x6   :  { %s806_s29 = scalar_lea.vmem %s42_s26, 64  ;;  %p811_p1 = scmp.lt.s32.totalorder %s42_s26, %s42_s26 }
   0x7   :  { %p807_p0 = scmp.ne.s32.totalorder %s42_s26, %s806_s29  ;;  %p812_p2 = scmp.lt.s32.totalorder %s806_s29, %s806_s29 }
   0x9   :  { %p813_p3 = por %p812_p2, %p811_p1 }
   0xb   :  { %p814_p4 = pnand %p813_p3, %p807_p0 }
   0xd   :  { %817 = shalt.err (!%p814_p4)
}
   0xe   :  { %44 = dma.hbm_to_vmem [thread:$0]  %s1175_s2, 64, %s42_s26, [#allocation6]  }
   0xf   :  { %s826_s15 = scalar_lea.vmem %s66_s28, 64  ;;  %p831_p6 = scmp.lt.s32.totalorder %s66_s28, %s66_s28 }
  0x10   :  { %p827_p5 = scmp.ne.s32.totalorder %s66_s28, %s826_s15  ;;  %p832_p7 = scmp.lt.s32.totalorder %s826_s15, %s826_s15 }
  0x12   :  { %p833_p8 = por %p832_p7, %p831_p6 }
  0x14   :  { %p834_p9 = pnand %p833_p8, %p827_p5 }
  0x16   :  { %837 = shalt.err (!%p834_p9)
}
  0x17   :  { %68 = dma.hbm_to_vmem [thread:$0]  %s1178_s5, 64, %s66_s28, [#allocation9]  }
  0x18   :  { %s970_s18 = smov [#allocation11]   ;;  %s971_s20 = smov [#allocation2]  }
  0x19   :  { %s85_s19 = sshll.u32 %s970_s18, 4  ;;  %s31_s21 = sshll.u32 %s971_s20, 4  ;;  %s86_s19 = int_to_ptr.vmem [resolvable:$true] %s85_s19  ;;  %s32_s21 = int_to_ptr.vmem [resolvable:$true] %s31_s21 }
  0x1a   :  { %s846_s22 = scalar_lea.vmem %s86_s19, 16  ;;  %s850_s2 = scalar_lea.vmem %s86_s19, 32 }
  0x1b   :  { %p847_p10 = scmp.ne.s32.totalorder %s86_s19, %s846_s22  ;;  %p851_p11 = scmp.lt.s32.totalorder %s86_s19, %s86_s19 }
  0x1c   :  { %p852_p12 = scmp.lt.s32.totalorder %s850_s2, %s846_s22 }
  0x1e   :  { %p853_p13 = por %p852_p12, %p851_p11 }
  0x20   :  { %p854_p0 = pnand %p853_p13, %p847_p10 }
  0x22   :  { %857 = shalt.err (!%p854_p0)
}
  0x23   :  { %88 = dma.hbm_to_vmem [thread:$0]  %s1180_s7, 16, %s86_s19, [#allocation12]  }
  0x24   :  { %s866_s25 = scalar_lea.vmem %s32_s21, 64  ;;  %p871_p2 = scmp.lt.s32.totalorder %s32_s21, %s32_s21 }
  0x25   :  { %p867_p1 = scmp.ne.s32.totalorder %s32_s21, %s866_s25  ;;  %p872_p3 = scmp.lt.s32.totalorder %s866_s25, %s866_s25 }
  0x27   :  { %p873_p4 = por %p872_p3, %p871_p2 }
  0x29   :  { %p874_p5 = pnand %p873_p4, %p867_p1 }
  0x2b   :  { %877 = shalt.err (!%p874_p5)
}
  0x2c   :  { %34 = dma.hbm_to_vmem [thread:$0]  %s1174_s1, 64, %s32_s21, [#allocation3]  }
  0x2d   :  { %s972_s27 = smov [#allocation7]  }
  0x2e   :  { %s52_s28 = sshll.u32 %s972_s27, 4  ;;  %s53_s28 = int_to_ptr.vmem [resolvable:$true] %s52_s28 }
  0x2f   :  { %s886_s29 = scalar_lea.vmem %s53_s28, 512  ;;  %p891_p7 = scmp.lt.s32.totalorder %s53_s28, %s53_s28 }
  0x30   :  { %p887_p6 = scmp.ne.s32.totalorder %s53_s28, %s886_s29  ;;  %p892_p8 = scmp.lt.s32.totalorder %s886_s29, %s886_s29 }
  0x32   :  { %p893_p9 = por %p892_p8, %p891_p7 }
  0x34   :  { %p894_p10 = pnand %p893_p9, %p887_p6 }
  0x36   :  { %897 = shalt.err (!%p894_p10)
}
  0x37   :  { %s973_s7 = smov 64   ;;  %s974_s30 = smov 4  }
  0x38   :  { %58 = dma.hbm_to_vmem [thread:$0]  %s1177_s4, 512, %s53_s28, [#allocation6], %s973_s7, %s973_s7, %s974_s30  }
  0x39   :  { %s975_s16 = smov [#allocation10]   ;;  %s976_s1 = smov [#allocation13]  }
  0x3a   :  { %s75_s17 = sshll.u32 %s975_s16, 4  ;;  %s95_s18 = sshll.u32 %s976_s1, 4  ;;  %s76_s17 = int_to_ptr.vmem [resolvable:$true] %s75_s17  ;;  %s96_s18 = int_to_ptr.vmem [resolvable:$true] %s95_s18 }
  0x3b   :  { %s906_s19 = scalar_lea.vmem %s76_s17, 16  ;;  %s910_s20 = scalar_lea.vmem %s76_s17, 32 }
  0x3c   :  { %p907_p11 = scmp.ne.s32.totalorder %s76_s17, %s906_s19  ;;  %p911_p12 = scmp.lt.s32.totalorder %s76_s17, %s76_s17 }
  0x3d   :  { %p912_p13 = scmp.lt.s32.totalorder %s910_s20, %s906_s19 }
  0x3f   :  { %p913_p0 = por %p912_p13, %p911_p12 }
  0x41   :  { %p914_p1 = pnand %p913_p0, %p907_p11 }
  0x43   :  { %917 = shalt.err (!%p914_p1)
}
  0x44   :  { %78 = dma.hbm_to_vmem [thread:$0]  %s1179_s6, 16, %s76_s17, [#allocation9]  }
  0x45   :  { %s926_s2 = scalar_lea.vmem %s96_s18, 16  ;;  %s930_s4 = scalar_lea.vmem %s96_s18, 32 }
  0x46   :  { %p927_p2 = scmp.ne.s32.totalorder %s96_s18, %s926_s2  ;;  %p931_p3 = scmp.lt.s32.totalorder %s96_s18, %s96_s18 }
  0x47   :  { %p932_p4 = scmp.lt.s32.totalorder %s930_s4, %s926_s2 }
  0x49   :  { %p933_p5 = por %p932_p4, %p931_p3 }
  0x4b   :  { %p934_p6 = pnand %p933_p5, %p927_p2 }
  0x4d   :  { %937 = shalt.err (!%p934_p6)
}
  0x4e   :  { %98 = dma.hbm_to_vmem [thread:$0]  %s1181_s8, 16, %s96_s18, [#allocation12]  }
  0x4f   :  { %958 = dma.done.wait [#allocation3], 64  }
  0x50   :  { %959 = vsyncadd [#allocation3], 4294967232 }
  0x51   :  { %960 = dma.done.wait [#allocation6], 576  }
  0x52   :  { %961 = vsyncadd [#allocation6], 4294966720 }
  0x53   :  { %962 = dma.done.wait [#allocation9], 80  }
  0x54   :  { %963 = vsyncadd [#allocation9], 4294967216 }
  0x55   :  { %964 = dma.done.wait [#allocation12], 32  }
  0x56   :  { %965 = vsyncadd [#allocation12], 4294967264  ;;  %v977_v0 = vmov 0.0   ;;  %vm978_vm0 = vmmov 0   ;;  %v770_v1 = vld [vmem:[#allocation7 + $0x18] sm:$0xff]   ;;  %v771_v2 = vld [vmem:[#allocation7 + $0x10] sm:$0xff]  }
  0x57   :  { %699 = vmatprep.subr.bf16.mxu1 %v977_v0  ;;  %693 = vmatprep.subr.bf16.mxu0 %v977_v0  ;;  %v772_v3 = vld [vmem:[%s1176_s3] sm:$0xff]   ;;  %vm145_vm1 = vcmask 130048   ;;  %vm286_vm2 = vcmask 1043456   ;;  %v274_v5 = vld [vmem:[#allocation8] sm:$0xf]  ;;  %v773_v6 = vld [vmem:[#allocation7 + $0x8] sm:$0xff]  }
  0x58   :  { %695 = vmatprep.mubr.msk.bf16.mxu0 %vm978_vm0, %v977_v0  ;;  %707 = vmatprep.mubr.msk.bf16.mxu1 %vm978_vm0, %v977_v0  ;;  %v129_v4 = vld [vmem:[%s1173_s0] sm:$0xf]  ;;  %v288_v7 = vsel %vm286_vm2, %v274_v5, 0  ;;  %v774_v8 = vld [vmem:[#allocation7] sm:$0xff]   ;;  %v273_v9 = vld [vmem:[#allocation5] sm:$0xf] }
  0x59   :  { %700 = vmatpush3.bf16.msra.mxu1 %v770_v1  ;;  %694 = vmatpush3.bf16.msra.mxu0 %v772_v3  ;;  %vm282_vm3 = vcmask 64512   ;;  %v775_v10 = vld [vmem:[%s1182_s9 + $0x38] sm:$0xff]   ;;  %v189_v11 = vld [vmem:[#allocation2] sm:$0xf]  ;;  %vm229_vm4 = vcmask 523264   ;;  %v776_v12 = vld [vmem:[%s1182_s9 + $0x30] sm:$0xff]  }
  0x5a   :  { %701 = vmatprep.subr.bf16.mxu1 %v977_v0  ;;  %711 = vmatprep.subr.bf16.mxu0 %v977_v0  ;;  %v777_v13 = vld [vmem:[%s1182_s9 + $0x28] sm:$0xff]   ;;  %v778_v14 = vld [vmem:[%s1182_s9 + $0x20] sm:$0xff]   ;;  %v779_v15 = vld [vmem:[%s1182_s9 + $0x18] sm:$0xff]   ;;  %v979_v44 = vmov 0  }
  0x5b   :  { %v780_v16 = vld [vmem:[%s1182_s9 + $0x10] sm:$0xff]   ;;  %v781_v17 = vld [vmem:[%s1182_s9 + $0x8] sm:$0xff]   ;;  %v782_v18 = vld [vmem:[%s1182_s9] sm:$0xff]  }
  0x5c   :  { %696 = vmatmul.mubr.msk.bf16.vlgmr.msra.gmra.mxu0 %vm145_vm1, %v129_v4  ;;  %v635_v22 = vld [vmem:[#allocation10] ss:$0 sm:$0xff]  ;;  %v638_v24 = vld [vmem:[#allocation11] ss:$0 sm:$0xff]  ;;  %v783_v43 = vld [vmem:[%s1183_s10] ss:$8 sps:$4 sm:$0xff]  }
  0x5d   :  { %702 = vmatpush3.bf16.msra.mxu1 %v771_v2  ;;  %712 = vmatpush3.bf16.msra.mxu0 %v288_v7  ;;  %v785_v42 = vld [vmem:[%s1183_s10 + $0x4] ss:$8 sps:$4 sm:$0xff]   ;;  %v786_v45 = vld [vmem:[%s1184_s11 + $0x38] sm:$0xff]   ;;  %v787_v46 = vld [vmem:[%s1184_s11 + $0x30] sm:$0xff]  }
  0x5e   :  { %703 = vmatprep.subr.bf16.mxu1 %v977_v0  ;;  %713 = vmatprep.mubr.msk.bf16.mxu0 %vm978_vm0, %v977_v0  ;;  %v788_v52 = vld [vmem:[%s1184_s11 + $0x28] sm:$0xff]   ;;  %v789_v53 = vld [vmem:[%s1184_s11 + $0x20] sm:$0xff]   ;;  %v790_v54 = vld [vmem:[%s1184_s11 + $0x18] sm:$0xff]  }
  0x5f   :  { %717 = vmatprep.subr.bf16.mxu0 %v977_v0  ;;  %v791_v55 = vld [vmem:[%s1184_s11 + $0x10] sm:$0xff]   ;;  %v792_v56 = vld [vmem:[%s1184_s11 + $0x8] sm:$0xff]   ;;  %v793_v57 = vld [vmem:[%s1184_s11] sm:$0xff]   ;;  %s980_s11 = smov [#allocation14]  }
  0x60   :  { %v644_v63 = vld [vmem:[#allocation13] ss:$0 sm:$0xff]  ;;  %s623_s16 = sshll.u32 %s980_s11, 4  ;;  %s624_s16 = int_to_ptr.vmem [resolvable:$true] %s623_s16 }
  0x61   :  { %704 = vmatpush3.bf16.msra.mxu1 %v773_v6  ;;  %v657_v6 = vld [vmem:[%s1185_s12] ss:$0 sm:$0xff]  ;;  %s938_s17 = scalar_lea.vmem %s624_s16, 128  ;;  %p943_p8 = scmp.lt.s32.totalorder %s624_s16, %s624_s16 }
  0x62   :  { %705 = vmatprep.subr.bf16.mxu1 %v977_v0  ;;  %p939_p7 = scmp.ne.s32.totalorder %s624_s16, %s938_s17  ;;  %p944_p9 = scmp.lt.s32.totalorder %s938_s17, %s938_s17 }
  0x64   :  { %714 = vmatmul.mubr.msk.bf16.vlgmr.msra.gmra.mxu0 %vm282_vm3, %v273_v9  ;;  %p945_p10 = por %p944_p9, %p943_p8 }
  0x65   :  { %706 = vmatpush3.bf16.msra.mxu1 %v774_v8  ;;  %718 = vmatpush3.bf16.msra.mxu0 %v775_v10 }
  0x66   :  { %737 = vmatprep.subr.bf16.mxu1 %v977_v0  ;;  %733 = vmatprep.mubr.msk.bf16.mxu0 %vm978_vm0, %v977_v0  ;;  %p946_p11 = pnand %p945_p10, %p939_p7 }
  0x67   :  { %719 = vmatprep.subr.bf16.mxu0 %v977_v0 }
  0x68   :  { %708 = vmatmul.mubr.msk.bf16.vlgmr.msra.gmra.mxu1 %vm229_vm4, %v189_v11 }
  0x69   :  { %753 = vmatprep.mubr.msk.bf16.mxu1 %vm978_vm0, %v977_v0  ;;  %720 = vmatpush3.bf16.msra.mxu0 %v776_v12 }
  0x6a   :  { %721 = vmatprep.subr.bf16.mxu0 %v977_v0  ;;  %738 = vmatpush3.bf16.msra.mxu1 %v786_v45 }
  0x6b   :  { %739 = vmatprep.subr.bf16.mxu1 %v977_v0 }
  0x6d   :  { %722 = vmatpush3.bf16.msra.mxu0 %v777_v13 }
  0x6e   :  { %723 = vmatprep.subr.bf16.mxu0 %v977_v0  ;;  %740 = vmatpush3.bf16.msra.mxu1 %v787_v46 }
  0x6f   :  { %741 = vmatprep.subr.bf16.mxu1 %v977_v0 }
  0x71   :  { %724 = vmatpush3.bf16.msra.mxu0 %v778_v14 }
  0x72   :  { %725 = vmatprep.subr.bf16.mxu0 %v977_v0  ;;  %742 = vmatpush3.bf16.msra.mxu1 %v788_v52 }
  0x73   :  { %743 = vmatprep.subr.bf16.mxu1 %v977_v0 }
  0x75   :  { %726 = vmatpush3.bf16.msra.mxu0 %v779_v15 }
  0x76   :  { %727 = vmatprep.subr.bf16.mxu0 %v977_v0  ;;  %744 = vmatpush3.bf16.msra.mxu1 %v789_v53 }
  0x77   :  { %745 = vmatprep.subr.bf16.mxu1 %v977_v0 }
  0x79   :  { %728 = vmatpush3.bf16.msra.mxu0 %v780_v16 }
  0x7a   :  { %729 = vmatprep.subr.bf16.mxu0 %v977_v0  ;;  %746 = vmatpush3.bf16.msra.mxu1 %v790_v54 }
  0x7b   :  { %747 = vmatprep.subr.bf16.mxu1 %v977_v0 }
  0x7d   :  { %730 = vmatpush3.bf16.msra.mxu0 %v781_v17 }
  0x7e   :  { %731 = vmatprep.subr.bf16.mxu0 %v977_v0  ;;  %748 = vmatpush3.bf16.msra.mxu1 %v791_v55 }
  0x7f   :  { %749 = vmatprep.subr.bf16.mxu1 %v977_v0 }
  0x81   :  { %732 = vmatpush3.bf16.msra.mxu0 %v782_v18 }
  0x82   :  { %472 = vmatprep.subr.bf16.mxu0 %v785_v42  ;;  %750 = vmatpush3.bf16.msra.mxu1 %v792_v56 }
  0x83   :  { %751 = vmatprep.subr.bf16.mxu1 %v977_v0 }
  0x86   :  { %752 = vmatpush3.bf16.msra.mxu1 %v793_v57 }
 0x11c   :  { %v183_v19 = vpop.f32.mrf.mxu0 }
 0x11d   :  { %v184_v26 = vadd.f32 %v635_v22, %v183_v19 }
 0x11e   :  { %v697_v20 = vpop.f32.mrf.mxu0 }
 0x120   :  { %v186_v21 = vpop.f32.mrf.mxu0 }
 0x122   :  { %v698_v23 = vpop.f32.mrf.mxu0 }
 0x124   :  { %v324_v25 = vpop.f32.mrf.mxu0 }
 0x125   :  { %v325_v1 = vadd.f32 %v644_v63, %v324_v25 }
 0x126   :  { %v715_v28 = vpop.f32.mrf.mxu0 }
 0x128   :  { %v267_v27 = vpop.f32.mrf.mxu1  ;;  %v327_v31 = vpop.f32.mrf.mxu0 }
 0x129   :  { %v268_v29 = vadd.f32 %v638_v24, %v267_v27 }
 0x12a   :  { %v709_v30 = vpop.f32.mrf.mxu1  ;;  %v716_v34 = vpop.f32.mrf.mxu0 }
 0x12b   :  { %v330_v32 = vmul.f32 %v268_v29, %v184_v26 }
 0x12c   :  { %v270_v33 = vpop.f32.mrf.mxu1 }
 0x12d   :  { %v331_v35 = vpack.c.bf16 %v330_v32, %v330_v32 }
 0x12e   :  { %v710_v36 = vpop.f32.mrf.mxu1 }
 0x12f   :  { %734 = vmatmul.mubr.bf16.vlgmr.msra.gmra.mxu0 %v331_v35 }
 0x130   :  { %473 = vmatpush1.bf16.msra.mxu0 %v783_v43  ;;  %490 = vmatprep.mubr.bf16.mxu0 %v979_v44 }
 0x1ef   :  { %v430_v37 = vpop.f32.mrf.mxu0 }
 0x1f0   :  { %v436_v38 = vsel %vm145_vm1, %v430_v37, -inf }
 0x1f1   :  { %v735_v39 = vpop.f32.mrf.mxu0  ;;  %437 = vmax.xlane.f32.xlu0 %v436_v38 }
 0x1f3   :  { %v433_v40 = vpop.f32.mrf.mxu0 }
 0x1f5   :  { %v736_v41 = vpop.f32.mrf.mxu0 }
 0x27a   :  { %v438_v47 = vpop.xlane.xlu0 %437 }
 0x27b   :  { %v439_v48 = vsub.f32 %v430_v37, %v438_v47 }
 0x27d   :  { %v440_v49 = vmul.f32 1.442695, %v439_v48 }
 0x27f   :  { %794 = vpow2.f32 %v440_v49 }
 0x28c   :  { %v795_v50 = vpop.eup %794 }
 0x28d   :  { %v442_v51 = vpack.c.bf16 %v795_v50, %v795_v50 }
 0x28f   :  { %656 = vmatmul.mubr.msk.bf16.vlgmr.msra.gmra.mxu0 %vm145_vm1, %v442_v51 }
 0x34f   :  { %v492_v58 = vpop.f32.mrf.mxu0 }
 0x350   :  { %v501_v2 = vmul.f32 %v492_v58, %v325_v1 }
 0x351   :  { %v494_v59 = vpop.f32.mrf.mxu0 }
 0x352   :  { %v499_v60 = vmax.f32 %v494_v59, 1e-30 }
 0x353   :  { %v496_v61 = vpop.f32.mrf.mxu0 }
 0x354   :  { %796 = vrcp.f32 %v499_v60 }
 0x355   :  { %v497_v62 = vpop.f32.mrf.mxu0 }
 0x361   :  { %v797_v3 = vpop.eup %796 }
 0x362   :  { %v502_v4 = vmul.f32 %v797_v3, %v501_v2 }
 0x364   :  { %v503_v5 = vpack.c.bf16 %v502_v4, %v502_v4 }
 0x366   :  { %754 = vmatmul.mubr.bf16.vlgmr.msra.gmra.mxu1 %v503_v5 }
 0x426   :  { %v609_v7 = vpop.f32.mrf.mxu1 }
 0x427   :  { %v610_v0 = vadd.f32 %v657_v6, %v609_v7 }
 0x428   :  { %v755_v8 = vpop.f32.mrf.mxu1 }
 0x429   :  { %v615_v9 = vmax.f32 %v610_v0, 0.0 }
 0x42a   :  { %v612_v10 = vpop.f32.mrf.mxu1 }
 0x42b   :  { %616 = vst [vmem:[#allocation14] sm:$0xff] %v615_v9 }
 0x42c   :  { %v756_v11 = vpop.f32.mrf.mxu1 }
 0x42d   :  { %949 = shalt.err (!%p946_p11)
}
 0x42e   :  { %626 = dma.vmem_to_hbm [thread:$0]  %s624_s16, 128, %s1186_s13, [#allocation4]  }
 0x42f   :  { %966 = dma.done.wait [#allocation4], 128  }
 0x430   :  { %967 = vsyncadd [#allocation4], 4294967168 }
 0x431   :  { %630 = vsyncpa [#allocation3], 1 }
 0x432   :  { %631 = vsyncpa [#allocation6], 1 }
 0x433   :  { %632 = vsyncpa [#allocation9], 1 }
 0x434   :  { %633 = vsyncpa [#allocation12], 1 }
 0x435   :  { %634 = vsyncpa [#allocation4], 1 }

</bundles_post_ra>
